<compile_context>
chip_gen: v7x
topology: tpu7x:2x2x1
jax: 0.10.0
libtpu: 0.0.40
codegen_flags: <defaults>
</compile_context>

<pallas_src>
import jax
import jax.numpy as jnp
from jax.experimental import pallas as pl
from jax.experimental.pallas import tpu as pltpu


def _round_up(x, m):
    return ((x + m - 1) // m) * m


def _vmem_capacity_bytes():
    """Per-core VMEM capacity; conservative fallback is v7x's 64 MiB."""
    try:
        cap = getattr(pltpu.get_tpu_info(), "vmem_capacity_bytes", None)
        if cap:
            return int(cap)
    except Exception:
        pass
    return 64 * 1024 * 1024


# ---------------------------------------------------------------------------
# Aggregation kernel factory.
#   grid = (row_blocks, col_blocks); acc_ref (tm, f_feat) f32 accumulates
#   A_blk @ F_blk over k; epilogue at the last k step.
#   apply_linear=True : epilogue = acc(bf16) @ W.T(bf16) + b   (aggregate-then-linear)
#   apply_linear=False: epilogue = acc + b                      (linear-then-aggregate)
# ---------------------------------------------------------------------------
def _make_agg_kernel(*, apply_linear, feat_resident, tk, gk):

    def _accumulate(blk_col_ref, adj_ref, feat_ref, acc_ref):
        i = pl.program_id(0)
        k = pl.program_id(1)

        @pl.when(k == 0)
        def _():
            acc_ref[...] = jnp.zeros_like(acc_ref)

        # Sparse-tile skip: blk_col[i*gk+k] == k only when adjacency block
        # (i, k) has nonzeros; all-zero blocks point back at the last nonzero
        # block (DMA elided by the pipeline) and skip the MXU work here.
        @pl.when(blk_col_ref[i * gk + k] == k)
        def _():
            if feat_resident:
                start = pl.multiple_of(k * tk, 128)
                feat = feat_ref[pl.ds(start, tk), :]
            else:
                feat = feat_ref[...]
            acc_ref[...] += jnp.dot(adj_ref[...], feat,
                                    preferred_element_type=jnp.float32)

    if apply_linear:
        def kernel(blk_col_ref, adj_ref, feat_ref, wt_ref, b_ref, o_ref, acc_ref):
            _accumulate(blk_col_ref, adj_ref, feat_ref, acc_ref)

            @pl.when(pl.program_id(1) == pl.num_programs(1) - 1)
            def _():
                # bf16 x bf16 MXU epilogue, f32 accumulation.
                out = jnp.dot(acc_ref[...].astype(jnp.bfloat16), wt_ref[...],
                              preferred_element_type=jnp.float32)
                o_ref[...] = (out + b_ref[...]).astype(o_ref.dtype)
    else:
        def kernel(blk_col_ref, adj_ref, feat_ref, b_ref, o_ref, acc_ref):
            _accumulate(blk_col_ref, adj_ref, feat_ref, acc_ref)

            @pl.when(pl.program_id(1) == pl.num_programs(1) - 1)
            def _():
                o_ref[...] = (acc_ref[...] + b_ref[...]).astype(o_ref.dtype)

    return kernel


# ---------------------------------------------------------------------------
# Feature pre-transform Y = X @ W.T (used when F_out < F_in).
# ---------------------------------------------------------------------------
def _linear_kernel(x_ref, wt_ref, o_ref):
    o_ref[...] = jnp.dot(x_ref[...], wt_ref[...],
                         preferred_element_type=jnp.float32).astype(o_ref.dtype)


def gcn_layer(adj, x, weight, bias, *, tm=512, tk=512):
    """GCN forward: out = (A @ X) @ W.T + b  ==  A @ (X @ W.T) + b.

    adj:    (N, N) adjacency, adj[i, j] = 1 iff edge j -> i
    x:      (N, F_in) node features
    weight: (F_out, F_in)   torch.nn.Linear layout
    bias:   (F_out,)
    """
    n, f_in = x.shape
    f_out = weight.shape[0]
    f_in_p = _round_up(f_in, 128)
    f_out_p = _round_up(f_out, 128)

    budget = int(_vmem_capacity_bytes() * 0.70)   # leave compiler-scratch headroom

    apply_linear = f_in <= f_out                  # aggregate first iff F_in <= F_out
    f_feat = f_in_p if apply_linear else f_out_p  # width streamed through the N^2 matmul

    # ---- tile selection ----------------------------------------------------
    # Row tile: multiple of 16 (bf16 sublane packing); sized so the parallel
    # row axis has >= 2 blocks when N allows (uses both v7x TensorCores).
    tm = max(16, min(tm, _round_up(-(-n // 2), 16)))
    tk = max(128, min(tk, _round_up(n, 128)))

    resident_cap = min(budget // 3, 32 * 1024 * 1024)

    def footprint(tm_, tk_, resident):
        fp = 2 * tm_ * tk_ * 2                                   # A tiles (bf16, 2 bufs)
        fp += (_round_up(n, tk_) * f_feat * 2 if resident
               else 2 * tk_ * f_feat * 2)                        # feature operand
        fp += 2 * tm_ * f_out_p * 4                              # output blocks
        fp += tm_ * f_feat * 4                                   # f32 accumulator
        fp += f_in_p * f_out_p * 2 + f_out_p * 4                 # resident W + bias
        return fp

    feat_resident = _round_up(n, tk) * f_feat * 2 <= resident_cap
    while footprint(tm, tk, feat_resident) > budget and (tk > 128 or tm > 16):
        if tk > 128:
            tk = max(128, _round_up(tk // 2, 128))
        else:
            tm = max(16, _round_up(tm // 2, 16))
    if feat_resident and footprint(tm, tk, True) > budget:
        feat_resident = False

    n_rows = _round_up(n, tm)
    n_cols = _round_up(n, tk)
    gi, gk = n_rows // tm, n_cols // tk

    # ---- operands: bf16 for the MXU (0/1 adjacency is exact in bf16) --------
    # Pad only when shapes aren't already tile-aligned (pure cast otherwise).
    adj_bf = adj.astype(jnp.bfloat16)
    adj_p = (adj_bf if (n_rows, n_cols) == (n, n)
             else jnp.pad(adj_bf, ((0, n_rows - n), (0, n_cols - n))))
    x_bf = x.astype(jnp.bfloat16)
    x_p = (x_bf if (n_cols, f_in_p) == (n, f_in)
           else jnp.pad(x_bf, ((0, n_cols - n), (0, f_in_p - f_in))))
    wt_p = jnp.pad(weight.T.astype(jnp.bfloat16),
                   ((0, f_in_p - f_in), (0, f_out_p - f_out)))
    b_p = jnp.pad(bias.astype(jnp.float32), (0, f_out_p - f_out)).reshape(1, f_out_p)

    # ---- per-(i,k) nonzero-block map (scalar-prefetched) --------------------
    # blk_col[i,k] = k if block (i,k) has nonzeros, else index of the last
    # nonzero block (0 if none yet): skipped steps revisit an already-resident
    # block so no fresh DMA is issued for them.
    blk_nz = jnp.any((adj_p != 0).reshape(gi, tm, gk, tk), axis=(1, 3))
    ks = jnp.arange(gk, dtype=jnp.int32)[None, :]
    blk_col = jax.lax.cummax(jnp.where(blk_nz, ks, jnp.int32(-1)), axis=1)
    blk_col = jnp.maximum(blk_col, 0).astype(jnp.int32).reshape(-1)

    if apply_linear:
        feat_p = x_p
    else:
        # Path B: transform features first (Y = X @ W.T), then aggregate Y.
        feat_p = pl.pallas_call(
            _linear_kernel,
            out_shape=jax.ShapeDtypeStruct((n_cols, f_out_p), jnp.bfloat16),
            grid_spec=pltpu.PrefetchScalarGridSpec(
                num_scalar_prefetch=0,
                grid=(gk,),
                in_specs=[
                    pl.BlockSpec((tk, f_in_p), lambda r: (r, 0)),
                    pl.BlockSpec((f_in_p, f_out_p), lambda r: (0, 0),
                                 pipeline_mode=pl.Buffered(1)),       # W.T resident
                ],
                out_specs=pl.BlockSpec((tk, f_out_p), lambda r: (r, 0)),
            ),
            compiler_params=pltpu.CompilerParams(
                dimension_semantics=("parallel",),
                vmem_limit_bytes=budget),
        )(x_p, wt_p)

    # ---- aggregation (+ fused linear epilogue on path A) --------------------
    if feat_resident:
        feat_spec = pl.BlockSpec((n_cols, f_feat), lambda i, k, c: (0, 0),
                                 pipeline_mode=pl.Buffered(1))        # resident X/Y
    else:
        feat_spec = pl.BlockSpec((tk, f_feat),
                                 lambda i, k, c: (c[i * gk + k], 0))

    in_specs = [
        pl.BlockSpec((tm, tk), lambda i, k, c: (i, c[i * gk + k])),   # A tile
        feat_spec,                                                    # X or Y
    ]
    args = [adj_p, feat_p]
    if apply_linear:
        in_specs.append(pl.BlockSpec((f_in_p, f_out_p), lambda i, k, c: (0, 0),
                                     pipeline_mode=pl.Buffered(1)))   # W.T resident
        args.append(wt_p)
    in_specs.append(pl.BlockSpec((1, f_out_p), lambda i, k, c: (0, 0),
                                 pipeline_mode=pl.Buffered(1)))       # bias resident
    args.append(b_p)

    flops = 2 * n_rows * n_cols * f_feat
    if apply_linear:
        flops += 2 * n_rows * f_in_p * f_out_p
    bytes_acc = (adj_p.size * 2 + n_cols * f_feat * 2 + wt_p.size * 2
                 + b_p.size * 4 + n_rows * f_out_p * 4)

    out_p = pl.pallas_call(
        _make_agg_kernel(apply_linear=apply_linear, feat_resident=feat_resident,
                         tk=tk, gk=gk),
        out_shape=jax.ShapeDtypeStruct((n_rows, f_out_p), jnp.float32),
        grid_spec=pltpu.PrefetchScalarGridSpec(
            num_scalar_prefetch=1,
            grid=(gi, gk),
            in_specs=in_specs,
            out_specs=pl.BlockSpec((tm, f_out_p), lambda i, k, c: (i, 0)),
            scratch_shapes=[pltpu.VMEM((tm, f_feat), jnp.float32)],
        ),
        compiler_params=pltpu.CompilerParams(
            dimension_semantics=("parallel", "arbitrary"),
            vmem_limit_bytes=budget),
        cost_estimate=pl.CostEstimate(
            flops=flops, transcendentals=0, bytes_accessed=bytes_acc),
    )(blk_col, *args)

    return out_p[:n, :f_out]


if __name__ == "__main__":
    key = jax.random.PRNGKey(0)
    k_adj, k_x, k_w, k_b = jax.random.split(key, 4)

    N = 8          # number of nodes
    IN_FEATS = 16
    OUT_FEATS = 32

    # Deterministic random graph (dense adjacency, edge j->i) + features.
    adj = (jax.random.uniform(k_adj, (N, N)) < 0.4).astype(jnp.float32)
    x = jax.random.normal(k_x, (N, IN_FEATS), dtype=jnp.float32)

    # nn.Linear(in_feats, out_feats) default init: U(-1/sqrt(in), 1/sqrt(in))
    bound = 1.0 / (IN_FEATS ** 0.5)
    weight = jax.random.uniform(k_w, (OUT_FEATS, IN_FEATS),
                                minval=-bound, maxval=bound, dtype=jnp.float32)
    bias = jax.random.uniform(k_b, (OUT_FEATS,),
                              minval=-bound, maxval=bound, dtype=jnp.float32)

    # Path A: F_in <= F_out  (aggregate, then linear).
    out = jax.block_until_ready(gcn_layer(adj, x, weight, bias))
    ref = (adj @ x) @ weight.T + bias
    assert out.shape == (N, OUT_FEATS)
    # bf16 operands on the MXU with f32 accumulation -> ~1e-2 relative budget.
    assert jnp.allclose(out, ref, atol=5e-2, rtol=5e-2), "mismatch (agg->linear path)"

    # Path B: F_out < F_in  (linear, then aggregate).
    k_w2, k_b2 = jax.random.split(k_b)
    OUT_SMALL = 8
    w2 = jax.random.uniform(k_w2, (OUT_SMALL, IN_FEATS),
                            minval=-bound, maxval=bound, dtype=jnp.float32)
    b2 = jax.random.uniform(k_b2, (OUT_SMALL,),
                            minval=-bound, maxval=bound, dtype=jnp.float32)
    out2 = jax.block_until_ready(gcn_layer(adj, x, w2, b2))
    ref2 = (adj @ x) @ w2.T + b2
    assert out2.shape == (N, OUT_SMALL)
    assert jnp.allclose(out2, ref2, atol=5e-2, rtol=5e-2), "mismatch (linear->agg path)"

    print("KERNEL_OK")
</pallas_src>

<mosaic_0001>
module attributes {stable_mosaic.version = 11 : i64} {
  func.func @kernel(%arg0: i32, %arg1: i32, %arg2: memref<1xi32, #tpu.memory_space<smem>>, %arg3: memref<16x128xbf16, #tpu.memory_space<vmem>>, %arg4: memref<128x128xbf16, #tpu.memory_space<vmem>>, %arg5: memref<128x128xbf16, #tpu.memory_space<vmem>>, %arg6: memref<1x128xf32, #tpu.memory_space<vmem>>, %arg7: memref<16x128xf32, #tpu.memory_space<vmem>>, %arg8: memref<16x128xf32, #tpu.memory_space<vmem>>) attributes {dimension_semantics = [#tpu.dimension_semantics<parallel>, #tpu.dimension_semantics<arbitrary>], iteration_bounds = array<i64: 1, 1>, scalar_prefetch = 1 : i64, scratch_operands = 1 : i64, tpu.core_type = #tpu.core_type<tc>, window_params = [{transform_indices = @transform_0, window_bounds = array<i64: 16, 128>}, {pipeline_mode = #tpu.pipeline_mode<synchronous>, transform_indices = @transform_1, window_bounds = array<i64: 128, 128>}, {pipeline_mode = #tpu.pipeline_mode<synchronous>, transform_indices = @transform_2, window_bounds = array<i64: 128, 128>}, {pipeline_mode = #tpu.pipeline_mode<synchronous>, transform_indices = @transform_3, window_bounds = array<i64: 1, 128>}, {transform_indices = @transform_4, window_bounds = array<i64: 16, 128>}]} {
    %c0_i32 = arith.constant 0 : i32
    %0 = arith.cmpi eq, %arg1, %c0_i32 : i32
    %1 = arith.extui %0 : i1 to i32
    %c0_i32_0 = arith.constant 0 : i32
    %2 = arith.cmpi ne, %1, %c0_i32_0 : i32
    scf.if %2 {
      %cst = arith.constant 0.000000e+00 : f32
      %13 = vector.broadcast %cst : f32 to vector<16x128xf32>
      %c0 = arith.constant 0 : index
      %c0_4 = arith.constant 0 : index
      %14 = vector.load %arg8[%c0, %c0_4] : memref<16x128xf32, #tpu.memory_space<vmem>>, vector<16x128xf32>
      tpu.vector_store %arg8[%c0, %c0_4], %13 {strides = array<i32>} : memref<16x128xf32, #tpu.memory_space<vmem>>, vector<16x128xf32>,
    } else {
    }
    %c1_i32 = arith.constant 1 : i32
    %3 = arith.muli %arg0, %c1_i32 : i32
    %4 = arith.addi %3, %arg1 : i32
    %5 = arith.index_cast %4 : i32 to index
    %6 = memref.load %arg2[%5] : memref<1xi32, #tpu.memory_space<smem>>
    %7 = arith.cmpi eq, %6, %arg1 : i32
    %8 = arith.extui %7 : i1 to i32
    %c0_i32_1 = arith.constant 0 : i32
    %9 = arith.cmpi ne, %8, %c0_i32_1 : i32
    scf.if %9 {
      %c128_i32 = arith.constant 128 : i32
      %13 = arith.muli %arg1, %c128_i32 : i32
      %14 = tpu.assume_multiple %13, 128 : i32
      %15 = arith.index_cast %14 : i32 to index
      %c0 = arith.constant 0 : index
      %16 = vector.load %arg4[%15, %c0] : memref<128x128xbf16, #tpu.memory_space<vmem>>, vector<128x128xbf16>
      %c0_4 = arith.constant 0 : index
      %c0_5 = arith.constant 0 : index
      %17 = vector.load %arg8[%c0_4, %c0_5] : memref<16x128xf32, #tpu.memory_space<vmem>>, vector<16x128xf32>
      %c0_6 = arith.constant 0 : index
      %c0_7 = arith.constant 0 : index
      %18 = vector.load %arg3[%c0_6, %c0_7] : memref<16x128xbf16, #tpu.memory_space<vmem>>, vector<16x128xbf16>
      %cst = arith.constant dense<0.000000e+00> : vector<16x128xf32>
      %19 = tpu.matmul %18, %16, %cst {dimension_numbers = #tpu.dot_dimension_numbers<[1], [0], [0], [1], [0, 0, 1, 1], [], []>} : vector<16x128xbf16>, vector<128x128xbf16>, vector<16x128xf32> -> vector<16x128xf32>
      %20 = arith.addf %17, %19 : vector<16x128xf32>
      %c0_8 = arith.constant 0 : index
      %c0_9 = arith.constant 0 : index
      %21 = vector.load %arg8[%c0_8, %c0_9] : memref<16x128xf32, #tpu.memory_space<vmem>>, vector<16x128xf32>
      tpu.vector_store %arg8[%c0_8, %c0_9], %20 {strides = array<i32>} : memref<16x128xf32, #tpu.memory_space<vmem>>, vector<16x128xf32>,
    } else {
    }
    %c0_i32_2 = arith.constant 0 : i32
    %10 = arith.cmpi eq, %arg1, %c0_i32_2 : i32
    %11 = arith.extui %10 : i1 to i32
    %c0_i32_3 = arith.constant 0 : i32
    %12 = arith.cmpi ne, %11, %c0_i32_3 : i32
    scf.if %12 {
      %c0 = arith.constant 0 : index
      %c0_4 = arith.constant 0 : index
      %13 = vector.load %arg8[%c0, %c0_4] : memref<16x128xf32, #tpu.memory_space<vmem>>, vector<16x128xf32>
      %14 = arith.truncf %13 : vector<16x128xf32> to vector<16x128xbf16>
      %c0_5 = arith.constant 0 : index
      %c0_6 = arith.constant 0 : index
      %15 = vector.load %arg5[%c0_5, %c0_6] : memref<128x128xbf16, #tpu.memory_space<vmem>>, vector<128x128xbf16>
      %cst = arith.constant dense<0.000000e+00> : vector<16x128xf32>
      %16 = tpu.matmul %14, %15, %cst {dimension_numbers = #tpu.dot_dimension_numbers<[1], [0], [0], [1], [0, 0, 1, 1], [], []>} : vector<16x128xbf16>, vector<128x128xbf16>, vector<16x128xf32> -> vector<16x128xf32>
      %c0_7 = arith.constant 0 : index
      %c0_8 = arith.constant 0 : index
      %17 = vector.load %arg6[%c0_7, %c0_8] : memref<1x128xf32, #tpu.memory_space<vmem>>, vector<1x128xf32>
      %18 = vector.broadcast %17 : vector<1x128xf32> to vector<16x128xf32>
      %19 = arith.addf %16, %18 : vector<16x128xf32>
      %c0_9 = arith.constant 0 : index
      %c0_10 = arith.constant 0 : index
      %20 = vector.load %arg7[%c0_9, %c0_10] : memref<16x128xf32, #tpu.memory_space<vmem>>, vector<16x128xf32>
      tpu.vector_store %arg7[%c0_9, %c0_10], %19 {strides = array<i32>} : memref<16x128xf32, #tpu.memory_space<vmem>>, vector<16x128xf32>,
    } else {
    }
    return
  }
  func.func @transform_0(%arg0: i32, %arg1: i32, %arg2: memref<1xi32, #tpu.memory_space<smem>>) -> (i32, i32) {
    %c1_i32 = arith.constant 1 : i32
    %0 = arith.muli %arg0, %c1_i32 : i32
    %1 = arith.addi %0, %arg1 : i32
    %2 = arith.index_cast %1 : i32 to index
    %3 = memref.load %arg2[%2] : memref<1xi32, #tpu.memory_space<smem>>
    %c0_i32 = arith.constant 0 : i32
    return %arg0, %3 : i32, i32
  }
  func.func @transform_1(%arg0: i32, %arg1: i32, %arg2: memref<1xi32, #tpu.memory_space<smem>>) -> (i32, i32) {
    %c0_i32 = arith.constant 0 : i32
    %c0_i32_0 = arith.constant 0 : i32
    %c0_i32_1 = arith.constant 0 : i32
    return %c0_i32, %c0_i32_0 : i32, i32
  }
  func.func @transform_2(%arg0: i32, %arg1: i32, %arg2: memref<1xi32, #tpu.memory_space<smem>>) -> (i32, i32) {
    %c0_i32 = arith.constant 0 : i32
    %c0_i32_0 = arith.constant 0 : i32
    %c0_i32_1 = arith.constant 0 : i32
    return %c0_i32, %c0_i32_0 : i32, i32
  }
  func.func @transform_3(%arg0: i32, %arg1: i32, %arg2: memref<1xi32, #tpu.memory_space<smem>>) -> (i32, i32) {
    %c0_i32 = arith.constant 0 : i32
    %c0_i32_0 = arith.constant 0 : i32
    %c0_i32_1 = arith.constant 0 : i32
    return %c0_i32, %c0_i32_0 : i32, i32
  }
  func.func @transform_4(%arg0: i32, %arg1: i32, %arg2: memref<1xi32, #tpu.memory_space<smem>>) -> (i32, i32) {
    %c0_i32 = arith.constant 0 : i32
    %c0_i32_0 = arith.constant 0 : i32
    return %arg0, %c0_i32 : i32, i32
  }
}

</mosaic_0001>

<bundles_post_ra>
// kernel: tpu_custom_call.1
= control target key start
LH: loop header
LB: loop body
LE: loop exit
PB: predicated region body
PF: predicated region fallthrough
CT: control target
= control target key end

     0   :  { %11 = vsyncpa [#allocation6], 0  ;;  %s672_s0 = inlined_call_operand.<no memory space> [shape: s32[1], index: 0, kind: input, shape index: {}]   ;;  %s673_s1 = inlined_call_operand.hbm [shape: bf16[16,128], index: 1, kind: input, shape index: {}]   ;;  %s674_s2 = inlined_call_operand.hbm [shape: bf16[128,128], index: 2, kind: input, shape index: {}]   ;;  %s675_s3 = inlined_call_operand.hbm [shape: bf16[128,128], index: 3, kind: input, shape index: {}]   ;;  %s676_s4 = inlined_call_operand.vmem [shape: f32[1,128], index: 4, kind: input, shape index: {}]   ;;  %s677_s5 = inlined_call_operand.hbm [shape: f32[16,128], index: 5, kind: output, shape index: {}]  }
   0x1   :  { %12 = vsyncpa [#allocation9], 0 }
   0x2   :  { %13 = vsyncpa [#allocation7], 0  ;;  %s346_s20 = sshll.u32 %s672_s0, 6  ;;  %s549_s21 = smov [#allocation8]  }
   0x3   :  { %s35_s22 = sshll.u32 %s549_s21, 4  ;;  %s597_s25 = scalar_lea.hbm %s673_s1, %s346_s20  ;;  %s36_s22 = int_to_ptr.vmem [resolvable:$true] %s35_s22 }
   0x4   :  { %s453_s28 = scalar_lea.hbm %s674_s2, 1024 }
   0x5   :  { %p454_p0 = scmp.ne.s32.totalorder %s674_s2, %s453_s28  ;;  %p457_p1 = scmp.lt.u32.totalorder %s453_s28, %s674_s2 }
   0x7   :  { %p459_p2 = pnand %p457_p1, %p454_p0 }
   0x9   :  { %462 = shalt.err (!%p459_p2)
}
   0xa   :  { %s463_s8 = scalar_lea.vmem %s36_s22, 1024  ;;  %p468_p4 = scmp.lt.s32.totalorder %s36_s22, %s36_s22 }
   0xb   :  { %p464_p3 = scmp.ne.s32.totalorder %s36_s22, %s463_s8  ;;  %p469_p5 = scmp.lt.s32.totalorder %s463_s8, %s463_s8 }
   0xd   :  { %p470_p6 = por %p469_p5, %p468_p4 }
   0xf   :  { %p471_p7 = pnand %p470_p6, %p464_p3 }
  0x11   :  { %474 = shalt.err (!%p471_p7)
}
  0x12   :  { %s550_s9 = smov 64   ;;  %s551_s10 = smov 4  }
  0x13   :  { %41 = dma.hbm_to_vmem [thread:$0]  %s674_s2, 1024, %s36_s22, [#allocation9], %s550_s9, %s550_s9, %s551_s10  }
  0x14   :  { %s552_s13 = smov [#allocation5]   ;;  %s553_s15 = smov [#allocation10]  }
  0x15   :  { %s23_s14 = sshll.u32 %s552_s13, 4  ;;  %s47_s16 = sshll.u32 %s553_s15, 4  ;;  %s24_s14 = int_to_ptr.vmem [resolvable:$true] %s23_s14  ;;  %s48_s16 = int_to_ptr.vmem [resolvable:$true] %s47_s16 }
  0x16   :  { %s475_s17 = scalar_lea.hbm %s597_s25, 128  ;;  %s477_s20 = scalar_lea.hbm %s673_s1, 128 }
  0x17   :  { %p476_p8 = scmp.ne.s32.totalorder %s597_s25, %s475_s17  ;;  %p478_p9 = scmp.lt.u32.totalorder %s597_s25, %s673_s1 }
  0x18   :  { %p479_p10 = scmp.lt.u32.totalorder %s477_s20, %s475_s17  ;;  %p481_p12 = scmp.lt.u32.totalorder %s475_s17, %s597_s25 }
  0x1a   :  { %p480_p11 = por %p479_p10, %p478_p9 }
  0x1c   :  { %p482_p13 = por %p481_p12, %p480_p11 }
  0x1e   :  { %p483_p0 = pnand %p482_p13, %p476_p8 }
  0x20   :  { %486 = shalt.err (!%p483_p0)
}
  0x21   :  { %s487_s2 = scalar_lea.vmem %s24_s14, 128  ;;  %p492_p2 = scmp.lt.s32.totalorder %s24_s14, %s24_s14 }
  0x22   :  { %p488_p1 = scmp.ne.s32.totalorder %s24_s14, %s487_s2  ;;  %p493_p3 = scmp.lt.s32.totalorder %s487_s2, %s487_s2 }
  0x24   :  { %p494_p4 = por %p493_p3, %p492_p2 }
  0x26   :  { %p495_p5 = pnand %p494_p4, %p488_p1 }
  0x28   :  { %498 = shalt.err (!%p495_p5)
}
  0x29   :  { %29 = dma.hbm_to_vmem [thread:$0]  %s597_s25, 128, %s24_s14, [#allocation6], %s550_s9, %s550_s9, %s551_s10  }
  0x2a   :  { %s499_s24 = scalar_lea.hbm %s675_s3, 1024 }
  0x2b   :  { %p500_p6 = scmp.ne.s32.totalorder %s675_s3, %s499_s24  ;;  %p503_p7 = scmp.lt.u32.totalorder %s499_s24, %s675_s3 }
  0x2d   :  { %p505_p8 = pnand %p503_p7, %p500_p6 }
  0x2f   :  { %508 = shalt.err (!%p505_p8)
}
  0x30   :  { %s509_s30 = scalar_lea.vmem %s48_s16, 1024  ;;  %p514_p10 = scmp.lt.s32.totalorder %s48_s16, %s48_s16 }
  0x31   :  { %p510_p9 = scmp.ne.s32.totalorder %s48_s16, %s509_s30  ;;  %p515_p11 = scmp.lt.s32.totalorder %s509_s30, %s509_s30 }
  0x33   :  { %p516_p12 = por %p515_p11, %p514_p10 }
  0x35   :  { %p517_p13 = pnand %p516_p12, %p510_p9 }
  0x37   :  { %520 = shalt.err (!%p517_p13)
}
  0x38   :  { %53 = dma.hbm_to_vmem [thread:$0]  %s675_s3, 1024, %s48_s16, [#allocation9], %s550_s9, %s550_s9, %s551_s10  }
  0x39   :  { %543 = dma.done.wait [#allocation6], 128  }
  0x3a   :  { %544 = vsyncadd [#allocation6], 4294967168 }
  0x3b   :  { %545 = dma.done.wait [#allocation9], 2048  }
  0x3c   :  { %546 = vsyncadd [#allocation9], 4294965248  ;;  %v554_v0 = vmov 0.0   ;;  %p347_p0 = scmp.ne.s32.totalorder %s672_s0, 0 }
  0x3d   :  { %72 = vst [vmem:[#allocation2] sm:$0xff] %v554_v0  ;;  %73 = vst [vmem:[#allocation2 + $0x8] sm:$0xff] %v554_v0  ;;  %v436_v1 = vld [vmem:[#allocation8] sm:$0xff] (!%p347_p0)   ;;  %v555_v2 = vmov (!%p347_p0), 0.0   ;;  %v437_v3 = vld [vmem:[#allocation8 + $0x8] sm:$0xff] (!%p347_p0)   ;;  %vm556_vm0 = vmmov (!%p347_p0), 0  }
  0x3e   :  { %79 = sbr.rel (%p347_p0) target bundleno = 311 (0x137), region = 37  ;;  %384 = vmatprep.subr.bf16.mxu0 (!%p347_p0), %v555_v2  ;;  %400 = vmatprep.mubr.msk.bf16.mxu0 (!%p347_p0), %vm556_vm0, %v555_v2  ;;  %v438_v4 = vld [vmem:[#allocation8 + $0x10] sm:$0xff] (!%p347_p0)   ;;  %v439_v5 = vld [vmem:[#allocation8 + $0x18] sm:$0xff] (!%p347_p0)   ;;  %v440_v6 = vld [vmem:[#allocation8 + $0x20] sm:$0xff] (!%p347_p0)  }
  0x3f   :  { %385 = vmatpush3.bf16.msra.mxu0 (!%p347_p0), %v436_v1  ;;  %v441_v7 = vld [vmem:[#allocation8 + $0x28] sm:$0xff] (!%p347_p0)   ;;  %v442_v8 = vld [vmem:[#allocation8 + $0x30] sm:$0xff] (!%p347_p0)   ;;  %v443_v9 = vld [vmem:[#allocation8 + $0x38] sm:$0xff] (!%p347_p0)  }
  0x40   :  { %386 = vmatprep.subr.bf16.mxu0 (!%p347_p0), %v555_v2  ;;  %v444_v10 = vld [vmem:[#allocation5] sm:$0xff] (!%p347_p0)  }
  0x43   :  { %387 = vmatpush3.bf16.msra.mxu0 (!%p347_p0), %v437_v3 }
  0x44   :  { %388 = vmatprep.subr.bf16.mxu0 (!%p347_p0), %v555_v2  ;;  %v101_v11 = vld [vmem:[#allocation2] sm:$0xff] (!%p347_p0)  ;;  %v102_v13 = vld [vmem:[#allocation2 + $0x8] sm:$0xff] (!%p347_p0) }
  0x47   :  { %389 = vmatpush3.bf16.msra.mxu0 %v438_v4 }
  0x48   :  { %390 = vmatprep.subr.bf16.mxu0 %v555_v2 }
  0x4b   :  { %391 = vmatpush3.bf16.msra.mxu0 %v439_v5 }
  0x4c   :  { %392 = vmatprep.subr.bf16.mxu0 %v555_v2 }
  0x4f   :  { %393 = vmatpush3.bf16.msra.mxu0 %v440_v6 }
  0x50   :  { %394 = vmatprep.subr.bf16.mxu0 %v555_v2 }
  0x53   :  { %395 = vmatpush3.bf16.msra.mxu0 %v441_v7 }
  0x54   :  { %396 = vmatprep.subr.bf16.mxu0 %v555_v2 }
  0x57   :  { %397 = vmatpush3.bf16.msra.mxu0 %v442_v8 }
  0x58   :  { %398 = vmatprep.subr.bf16.mxu0 %v555_v2 }
  0x5b   :  { %399 = vmatpush3.bf16.msra.mxu0 %v443_v9 }
  0x5e   :  { %401 = vmatmul.mubr.bf16.vlgmr.msra.gmra.mrb[0].mxu0 %v444_v10 }
 0x131   :  { %v193_v12 = vpop.f32.mrb[0].mxu0 }
 0x132   :  { %v200_v14 = vadd.f32 %v193_v12, %v101_v11  ;;  %v402_v15 = vpop.f32.mrb[1].mxu0 }
 0x133   :  { %v196_v16 = vpop.f32.mrb[2].mxu0 }
 0x134   :  { %202 = vst [vmem:[#allocation2] sm:$0xff] %v200_v14  ;;  %v201_v17 = vadd.f32 %v196_v16, %v102_v13  ;;  %v403_v18 = vpop.f32.mrb[3].mxu0 }
 0x136   :  { %203 = vst [vmem:[#allocation2 + $0x8] sm:$0xff] %v201_v17 }
 0x137 PF:  { %404 = vmatprep.subr.bf16.mxu0 %v554_v0  ;;  %v445_v19 = vld [vmem:[#allocation10] sm:$0xff]   ;;  %vm557_vm1 = vmmov 0   ;;  %v446_v20 = vld [vmem:[#allocation10 + $0x8] sm:$0xff]   ;;  %v447_v21 = vld [vmem:[#allocation10 + $0x10] sm:$0xff]   ;;  %s558_s9 = smov [#allocation11]  }
 0x138   :  { %420 = vmatprep.mubr.msk.bf16.mxu0 %vm557_vm1, %v554_v0  ;;  %405 = vmatpush3.bf16.msra.mxu0 %v445_v19  ;;  %v448_v22 = vld [vmem:[#allocation10 + $0x18] sm:$0xff]   ;;  %v449_v23 = vld [vmem:[#allocation10 + $0x20] sm:$0xff]   ;;  %v450_v24 = vld [vmem:[#allocation10 + $0x28] sm:$0xff]   ;;  %s329_s10 = sshll.u32 %s558_s9, 4  ;;  %s330_s10 = int_to_ptr.vmem [resolvable:$true] %s329_s10 }
 0x139   :  { %406 = vmatprep.subr.bf16.mxu0 %v554_v0  ;;  %v451_v25 = vld [vmem:[#allocation10 + $0x30] sm:$0xff]   ;;  %v452_v26 = vld [vmem:[#allocation10 + $0x38] sm:$0xff]   ;;  %v357_v30 = vld [vmem:[%s676_s4] ss:$0 sm:$0xff]  ;;  %s521_s11 = scalar_lea.vmem %s330_s10, 256  ;;  %p526_p2 = scmp.lt.s32.totalorder %s330_s10, %s330_s10 }
 0x13a   :  { %p522_p1 = scmp.ne.s32.totalorder %s330_s10, %s521_s11  ;;  %p527_p3 = scmp.lt.s32.totalorder %s521_s11, %s521_s11 }
 0x13b   :  { %v207_v27 = vld [vmem:[#allocation2] sm:$0xff] }
 0x13c   :  { %407 = vmatpush3.bf16.msra.mxu0 %v446_v20  ;;  %p528_p4 = por %p527_p3, %p526_p2 }
 0x13d   :  { %408 = vmatprep.subr.bf16.mxu0 %v554_v0  ;;  %v208_v28 = vld [vmem:[#allocation2 + $0x8] sm:$0xff] }
 0x13e   :  { %v209_v29 = vpack.c.bf16 %v208_v28, %v207_v27  ;;  %p529_p5 = pnand %p528_p4, %p522_p1 }
 0x140   :  { %409 = vmatpush3.bf16.msra.mxu0 %v447_v21 }
 0x141   :  { %410 = vmatprep.subr.bf16.mxu0 %v554_v0 }
 0x144   :  { %411 = vmatpush3.bf16.msra.mxu0 %v448_v22 }
 0x145   :  { %412 = vmatprep.subr.bf16.mxu0 %v554_v0 }
 0x148   :  { %413 = vmatpush3.bf16.msra.mxu0 %v449_v23 }
 0x149   :  { %414 = vmatprep.subr.bf16.mxu0 %v554_v0 }
 0x14c   :  { %415 = vmatpush3.bf16.msra.mxu0 %v450_v24 }
 0x14d   :  { %416 = vmatprep.subr.bf16.mxu0 %v554_v0 }
 0x150   :  { %417 = vmatpush3.bf16.msra.mxu0 %v451_v25 }
 0x151   :  { %418 = vmatprep.subr.bf16.mxu0 %v554_v0 }
 0x154   :  { %419 = vmatpush3.bf16.msra.mxu0 %v452_v26 }
 0x157   :  { %421 = vmatmul.mubr.bf16.vlgmr.msra.gmra.mrb[0].mxu0 %v209_v29 }
 0x22a   :  { %v315_v31 = vpop.f32.mrb[0].mxu0 }
 0x22b   :  { %v316_v32 = vadd.f32 %v357_v30, %v315_v31  ;;  %v422_v33 = vpop.f32.mrb[1].mxu0 }
 0x22c   :  { %v318_v34 = vpop.f32.mrb[2].mxu0 }
 0x22d   :  { %322 = vst [vmem:[#allocation11] sm:$0xff] %v316_v32  ;;  %v319_v35 = vadd.f32 %v357_v30, %v318_v34  ;;  %v423_v36 = vpop.f32.mrb[3].mxu0 }
 0x22f   :  { %323 = vst [vmem:[#allocation11 + $0x8] sm:$0xff] %v319_v35 }
 0x230   :  { %532 = shalt.err (!%p529_p5)
}
 0x231   :  { %s533_s13 = scalar_lea.hbm %s677_s5, 256 }
 0x232   :  { %p534_p6 = scmp.ne.s32.totalorder %s677_s5, %s533_s13  ;;  %p537_p7 = scmp.lt.u32.totalorder %s533_s13, %s677_s5 }
 0x234   :  { %p539_p8 = pnand %p537_p7, %p534_p6 }
 0x236   :  { %542 = shalt.err (!%p539_p8)
}
 0x237   :  { %s559_s18 = smov 128   ;;  %s560_s19 = smov 8  }
 0x238   :  { %335 = dma.vmem_to_hbm [thread:$0]  %s330_s10, 256, %s677_s5, [#allocation7], %s559_s18, %s559_s18, %s560_s19  }
 0x239   :  { %547 = dma.done.wait [#allocation7], 256  }
 0x23a   :  { %548 = vsyncadd [#allocation7], 4294967040 }
 0x23b   :  { %339 = vsyncpa [#allocation6], 1 }
 0x23c   :  { %340 = vsyncpa [#allocation9], 1 }
 0x23d   :  { %341 = vsyncpa [#allocation7], 1 }

</bundles_post_ra>
